<compile_context>
chip_gen: v7x
topology: tpu7x:2x2x1
jax: 0.10.0
libtpu: 0.0.40
codegen_flags: <defaults>
</compile_context>

<pallas_src>
import numpy as np
import jax
import jax.numpy as jnp
from jax.experimental import pallas as pl
from jax.experimental.pallas import tpu as pltpu


def critic_cql_kernel(s_ref, a_ref,
                      w1s_ref, w1a_ref, b1_ref,
                      w2_ref, b2_ref,
                      w3_ref, b3_ref,
                      w5_ref, b5_ref,
                      out_ref):
    """Fused 4-layer MLP (3x ReLU + linear head) on a single batch tile."""
    s = s_ref[...]          # bf16 (tile, Ds)
    a = a_ref[...]          # bf16 (tile, Da)

    # fc1, split across the (state | action) halves — replaces the torch.cat.
    h1 = (jnp.dot(s, w1s_ref[...], preferred_element_type=jnp.float32)
          + jnp.dot(a, w1a_ref[...], preferred_element_type=jnp.float32)
          + b1_ref[...])
    h1 = jnp.maximum(h1, 0.0)

    h2 = jnp.dot(h1.astype(jnp.bfloat16), w2_ref[...],
                 preferred_element_type=jnp.float32) + b2_ref[...]
    h2 = jnp.maximum(h2, 0.0)

    h3 = jnp.dot(h2.astype(jnp.bfloat16), w3_ref[...],
                 preferred_element_type=jnp.float32) + b3_ref[...]
    h3 = jnp.maximum(h3, 0.0)

    # Head: N=1 column — VPU multiply + lane reduction (keeps the 1-column push off
    # the MXU chain), then an XLU transpose to a lane-dense (1, tile) row store.
    q = jnp.sum(h3 * w5_ref[...].astype(jnp.float32), axis=-1, keepdims=True)
    q = (q + b5_ref[...]).astype(out_ref.dtype)          # (tile, 1) f32
    out_ref[0] = q.T                                      # (1, tile) lane-dense


def _round_up(x, m):
    return -(-x // m) * m


def critic_cql_forward(state, action, params, *, batch_tile=None):
    """Wrapper: bf16 inputs, ragged-batch-safe tiling, lane-dense output."""
    w1s, w1a, b1, w2, b2, w3, b3, w5, b5 = params

    # Convert activations once to bf16 (no-op if caller already supplies bf16).
    if state.dtype != jnp.bfloat16:
        state = state.astype(jnp.bfloat16)
    if action.dtype != jnp.bfloat16:
        action = action.astype(jnp.bfloat16)

    B, Ds = state.shape
    Da = action.shape[1]
    H1 = w1s.shape[1]
    H2 = w2.shape[1]
    H3 = w3.shape[1]

    # Batch tile: big enough to amortize ~0.35us/step overhead, small enough that
    # large batches keep >= 4 grid steps (v7x megacore + pipelining).
    if batch_tile is None:
        batch_tile = 2048
    batch_tile = int(batch_tile)
    batch_tile = min(batch_tile, max(256, _round_up(B, 4) // 4))
    batch_tile = _round_up(max(batch_tile, 16), 16)       # bf16 sublane pack
    if batch_tile >= B:
        batch_tile = _round_up(B, 8)                      # single full-batch tile

    num_tiles = pl.cdiv(B, batch_tile)                    # ragged tail handled by Pallas
    grid = (num_tiles,)

    def rep(shape):
        # Replicated (weights / biases): same block every grid step -> stays resident.
        return pl.BlockSpec(shape, lambda i: (0,) * len(shape))

    flops = 2 * B * ((Ds + Da) * H1 + H1 * H2 + H2 * H3 + H3)
    bytes_accessed = (2 * B * (Ds + Da)                                   # bf16 acts in
                      + 4 * num_tiles * batch_tile                        # f32 q out
                      + 2 * ((Ds + Da) * H1 + H1 * H2 + H2 * H3 + H3)     # bf16 weights
                      + 4 * (H1 + H2 + H3 + 1))                           # f32 biases
    cost = pl.CostEstimate(flops=int(flops), transcendentals=0,
                           bytes_accessed=int(bytes_accessed))

    out = pl.pallas_call(
        critic_cql_kernel,
        out_shape=jax.ShapeDtypeStruct((num_tiles, 1, batch_tile), jnp.float32),
        grid_spec=pltpu.PrefetchScalarGridSpec(
            num_scalar_prefetch=0,
            grid=grid,
            in_specs=[
                pl.BlockSpec((batch_tile, Ds), lambda i: (i, 0)),   # state tile (bf16)
                pl.BlockSpec((batch_tile, Da), lambda i: (i, 0)),   # action tile (bf16)
                rep((Ds, H1)), rep((Da, H1)), rep((1, H1)),         # fc1 (split)
                rep((H1, H2)), rep((1, H2)),                        # fc2
                rep((H2, H3)), rep((1, H3)),                        # fc3
                rep((1, H3)),  rep((1, 1)),                         # fc5 (head row)
            ],
            out_specs=pl.BlockSpec((1, 1, batch_tile), lambda i: (i, 0, 0)),
        ),
        compiler_params=pltpu.CompilerParams(
            dimension_semantics=("parallel",)),
        cost_estimate=cost,
    )(state, action, w1s, w1a, b1, w2, b2, w3, b3, w5, b5)

    # (num_tiles, 1, tile) lane-dense slab -> (B, 1), dropping any ragged tail.
    return out.reshape(num_tiles * batch_tile)[:B].reshape(B, 1)


def init_critic_cql_params(key, state_size, action_size,
                           hidden_size=32, hidden_size2=64):
    """Deterministic init mirroring Critic_CQL.__init__/reset_parameters.

    hidden_init uses lim = 1/sqrt(weight.size(0)) (= out_features in PyTorch) for
    fc1-3 weights; fc5 weight ~ U(-3e-3, 3e-3); biases keep the default nn.Linear
    init U(-1/sqrt(in_features), 1/sqrt(in_features)).

    Storage: fc1 weight split into (state_size, H1) and (action_size, H1) halves,
    fc2/fc3 as (in, out), head as a row (1, H3).  Weights bf16, biases f32.
    """
    d_in = state_size + action_size
    ks = jax.random.split(key, 8)

    def unif(k, shape, lim, dtype=jnp.bfloat16):
        return jax.random.uniform(k, shape, jnp.float32, -lim, lim).astype(dtype)

    w1 = unif(ks[0], (d_in, hidden_size), 1.0 / np.sqrt(hidden_size))
    w1s, w1a = w1[:state_size], w1[state_size:]
    b1 = unif(ks[1], (1, hidden_size), 1.0 / np.sqrt(d_in), jnp.float32)
    w2 = unif(ks[2], (hidden_size, hidden_size2), 1.0 / np.sqrt(hidden_size2))
    b2 = unif(ks[3], (1, hidden_size2), 1.0 / np.sqrt(hidden_size), jnp.float32)
    w3 = unif(ks[4], (hidden_size2, hidden_size), 1.0 / np.sqrt(hidden_size))
    b3 = unif(ks[5], (1, hidden_size), 1.0 / np.sqrt(hidden_size2), jnp.float32)
    w5 = unif(ks[6], (1, hidden_size), 3e-3)                       # head row (1, H3)
    b5 = unif(ks[7], (1, 1), 1.0 / np.sqrt(hidden_size), jnp.float32)
    return (w1s, w1a, b1, w2, b2, w3, b3, w5, b5)


def _reference_forward(state, action, params):
    """Pure-JAX f32 reference (same bf16 weight values, f32 math, f32 activations)."""
    w1s, w1a, b1, w2, b2, w3, b3, w5, b5 = params
    w1 = jnp.concatenate([w1s, w1a], axis=0).astype(jnp.float32)
    x = jnp.concatenate([state, action], axis=-1).astype(jnp.float32)
    h = jnp.maximum(x @ w1 + b1, 0.0)
    h = jnp.maximum(h @ w2.astype(jnp.float32) + b2, 0.0)
    h = jnp.maximum(h @ w3.astype(jnp.float32) + b3, 0.0)
    return h @ w5.astype(jnp.float32).T + b5


if __name__ == "__main__":
    key = jax.random.PRNGKey(0)
    k_state, k_action, k_params = jax.random.split(key, 3)

    batch = 8
    state_size = 8
    action_size = 4
    hidden_size = 32
    hidden_size2 = 64

    state = jax.random.normal(k_state, (batch, state_size), jnp.float32)
    action = jax.random.normal(k_action, (batch, action_size), jnp.float32)
    params = init_critic_cql_params(k_params, state_size, action_size,
                                    hidden_size, hidden_size2)

    q = critic_cql_forward(state, action, params)
    q = jax.block_until_ready(q)

    q_ref = _reference_forward(state, action, params)
    np.testing.assert_allclose(np.asarray(q), np.asarray(q_ref),
                               rtol=2e-2, atol=5e-3)
    assert q.shape == (batch, 1)

    print("KERNEL_OK")
</pallas_src>

<mosaic_0001>
module attributes {stable_mosaic.version = 11 : i64} {
  func.func @critic_cql_kernel(%arg0: i32, %arg1: memref<8x8xbf16, #tpu.memory_space<vmem>>, %arg2: memref<8x4xbf16, #tpu.memory_space<vmem>>, %arg3: memref<8x32xbf16, #tpu.memory_space<vmem>>, %arg4: memref<4x32xbf16, #tpu.memory_space<vmem>>, %arg5: memref<1x32xf32, #tpu.memory_space<vmem>>, %arg6: memref<32x64xbf16, #tpu.memory_space<vmem>>, %arg7: memref<1x64xf32, #tpu.memory_space<vmem>>, %arg8: memref<64x32xbf16, #tpu.memory_space<vmem>>, %arg9: memref<1x32xf32, #tpu.memory_space<vmem>>, %arg10: memref<1x32xbf16, #tpu.memory_space<vmem>>, %arg11: memref<1x1xf32, #tpu.memory_space<vmem>>, %arg12: memref<1x1x8xf32, #tpu.memory_space<vmem>>) attributes {dimension_semantics = [#tpu.dimension_semantics<parallel>], iteration_bounds = array<i64: 1>, scalar_prefetch = 0 : i64, scratch_operands = 0 : i64, tpu.core_type = #tpu.core_type<tc>, window_params = [{transform_indices = @transform_0, window_bounds = array<i64: 8, 8>}, {transform_indices = @transform_1, window_bounds = array<i64: 8, 4>}, {pipeline_mode = #tpu.pipeline_mode<synchronous>, transform_indices = @transform_2, window_bounds = array<i64: 8, 32>}, {pipeline_mode = #tpu.pipeline_mode<synchronous>, transform_indices = @transform_3, window_bounds = array<i64: 4, 32>}, {pipeline_mode = #tpu.pipeline_mode<synchronous>, transform_indices = @transform_4, window_bounds = array<i64: 1, 32>}, {pipeline_mode = #tpu.pipeline_mode<synchronous>, transform_indices = @transform_5, window_bounds = array<i64: 32, 64>}, {pipeline_mode = #tpu.pipeline_mode<synchronous>, transform_indices = @transform_6, window_bounds = array<i64: 1, 64>}, {pipeline_mode = #tpu.pipeline_mode<synchronous>, transform_indices = @transform_7, window_bounds = array<i64: 64, 32>}, {pipeline_mode = #tpu.pipeline_mode<synchronous>, transform_indices = @transform_8, window_bounds = array<i64: 1, 32>}, {pipeline_mode = #tpu.pipeline_mode<synchronous>, transform_indices = @transform_9, window_bounds = array<i64: 1, 32>}, {pipeline_mode = #tpu.pipeline_mode<synchronous>, transform_indices = @transform_10, window_bounds = array<i64: 1, 1>}, {transform_indices = @transform_11, window_bounds = array<i64: 1, 1, 8>}]} {
    %c0 = arith.constant 0 : index
    %c0_0 = arith.constant 0 : index
    %0 = vector.load %arg1[%c0, %c0_0] : memref<8x8xbf16, #tpu.memory_space<vmem>>, vector<8x8xbf16>
    %c0_1 = arith.constant 0 : index
    %c0_2 = arith.constant 0 : index
    %1 = vector.load %arg2[%c0_1, %c0_2] : memref<8x4xbf16, #tpu.memory_space<vmem>>, vector<8x4xbf16>
    %c0_3 = arith.constant 0 : index
    %c0_4 = arith.constant 0 : index
    %2 = vector.load %arg3[%c0_3, %c0_4] : memref<8x32xbf16, #tpu.memory_space<vmem>>, vector<8x32xbf16>
    %cst = arith.constant dense<0.000000e+00> : vector<8x32xf32>
    %3 = tpu.matmul %0, %2, %cst {dimension_numbers = #tpu.dot_dimension_numbers<[1], [0], [0], [1], [0, 0, 1, 1], [], []>} : vector<8x8xbf16>, vector<8x32xbf16>, vector<8x32xf32> -> vector<8x32xf32>
    %c0_5 = arith.constant 0 : index
    %c0_6 = arith.constant 0 : index
    %4 = vector.load %arg4[%c0_5, %c0_6] : memref<4x32xbf16, #tpu.memory_space<vmem>>, vector<4x32xbf16>
    %cst_7 = arith.constant dense<0.000000e+00> : vector<8x32xf32>
    %5 = tpu.matmul %1, %4, %cst_7 {dimension_numbers = #tpu.dot_dimension_numbers<[1], [0], [0], [1], [0, 0, 1, 1], [], []>} : vector<8x4xbf16>, vector<4x32xbf16>, vector<8x32xf32> -> vector<8x32xf32>
    %6 = arith.addf %3, %5 : vector<8x32xf32>
    %c0_8 = arith.constant 0 : index
    %c0_9 = arith.constant 0 : index
    %7 = vector.load %arg5[%c0_8, %c0_9] : memref<1x32xf32, #tpu.memory_space<vmem>>, vector<1x32xf32>
    %8 = vector.broadcast %7 : vector<1x32xf32> to vector<8x32xf32>
    %9 = arith.addf %6, %8 : vector<8x32xf32>
    %cst_10 = arith.constant 0.000000e+00 : f32
    %10 = vector.broadcast %cst_10 : f32 to vector<8x32xf32>
    %11 = arith.maximumf %9, %10 : vector<8x32xf32>
    %12 = arith.truncf %11 : vector<8x32xf32> to vector<8x32xbf16>
    %c0_11 = arith.constant 0 : index
    %c0_12 = arith.constant 0 : index
    %13 = vector.load %arg6[%c0_11, %c0_12] : memref<32x64xbf16, #tpu.memory_space<vmem>>, vector<32x64xbf16>
    %cst_13 = arith.constant dense<0.000000e+00> : vector<8x64xf32>
    %14 = tpu.matmul %12, %13, %cst_13 {dimension_numbers = #tpu.dot_dimension_numbers<[1], [0], [0], [1], [0, 0, 1, 1], [], []>} : vector<8x32xbf16>, vector<32x64xbf16>, vector<8x64xf32> -> vector<8x64xf32>
    %c0_14 = arith.constant 0 : index
    %c0_15 = arith.constant 0 : index
    %15 = vector.load %arg7[%c0_14, %c0_15] : memref<1x64xf32, #tpu.memory_space<vmem>>, vector<1x64xf32>
    %16 = vector.broadcast %15 : vector<1x64xf32> to vector<8x64xf32>
    %17 = arith.addf %14, %16 : vector<8x64xf32>
    %cst_16 = arith.constant 0.000000e+00 : f32
    %18 = vector.broadcast %cst_16 : f32 to vector<8x64xf32>
    %19 = arith.maximumf %17, %18 : vector<8x64xf32>
    %20 = arith.truncf %19 : vector<8x64xf32> to vector<8x64xbf16>
    %c0_17 = arith.constant 0 : index
    %c0_18 = arith.constant 0 : index
    %21 = vector.load %arg8[%c0_17, %c0_18] : memref<64x32xbf16, #tpu.memory_space<vmem>>, vector<64x32xbf16>
    %cst_19 = arith.constant dense<0.000000e+00> : vector<8x32xf32>
    %22 = tpu.matmul %20, %21, %cst_19 {dimension_numbers = #tpu.dot_dimension_numbers<[1], [0], [0], [1], [0, 0, 1, 1], [], []>} : vector<8x64xbf16>, vector<64x32xbf16>, vector<8x32xf32> -> vector<8x32xf32>
    %c0_20 = arith.constant 0 : index
    %c0_21 = arith.constant 0 : index
    %23 = vector.load %arg9[%c0_20, %c0_21] : memref<1x32xf32, #tpu.memory_space<vmem>>, vector<1x32xf32>
    %24 = vector.broadcast %23 : vector<1x32xf32> to vector<8x32xf32>
    %25 = arith.addf %22, %24 : vector<8x32xf32>
    %cst_22 = arith.constant 0.000000e+00 : f32
    %26 = vector.broadcast %cst_22 : f32 to vector<8x32xf32>
    %27 = arith.maximumf %25, %26 : vector<8x32xf32>
    %c0_23 = arith.constant 0 : index
    %c0_24 = arith.constant 0 : index
    %28 = vector.load %arg10[%c0_23, %c0_24] : memref<1x32xbf16, #tpu.memory_space<vmem>>, vector<1x32xbf16>
    %29 = arith.extf %28 : vector<1x32xbf16> to vector<1x32xf32>
    %30 = vector.broadcast %29 : vector<1x32xf32> to vector<8x32xf32>
    %31 = arith.mulf %27, %30 : vector<8x32xf32>
    %cst_25 = arith.constant dense<0.000000e+00> : vector<8xf32>
    %32 = vector.multi_reduction <add>, %31, %cst_25 [1] : vector<8x32xf32> to vector<8xf32>
    %33 = vector.shape_cast %32 : vector<8xf32> to vector<8x1xf32>
    %c0_26 = arith.constant 0 : index
    %c0_27 = arith.constant 0 : index
    %34 = vector.load %arg11[%c0_26, %c0_27] : memref<1x1xf32, #tpu.memory_space<vmem>>, vector<1x1xf32>
    %35 = vector.broadcast %34 : vector<1x1xf32> to vector<8x1xf32>
    %36 = arith.addf %33, %35 : vector<8x1xf32>
    %37 = tpu.transpose %36, [1, 0] : vector<8x1xf32> -> vector<1x8xf32>
    %c0_28 = arith.constant 0 : index
    %c0_29 = arith.constant 0 : index
    %c0_30 = arith.constant 0 : index
    %38 = vector.load %arg12[%c0_28, %c0_29, %c0_30] : memref<1x1x8xf32, #tpu.memory_space<vmem>>, vector<1x1x8xf32>
    %39 = vector.shape_cast %38 : vector<1x1x8xf32> to vector<1x8xf32>
    %40 = vector.shape_cast %37 : vector<1x8xf32> to vector<1x1x8xf32>
    tpu.vector_store %arg12[%c0_28, %c0_29, %c0_30], %40 {strides = array<i32>} : memref<1x1x8xf32, #tpu.memory_space<vmem>>, vector<1x1x8xf32>,
    return
  }
  func.func @transform_0(%arg0: i32) -> (i32, i32) {
    %c0_i32 = arith.constant 0 : i32
    %c0_i32_0 = arith.constant 0 : i32
    return %arg0, %c0_i32 : i32, i32
  }
  func.func @transform_1(%arg0: i32) -> (i32, i32) {
    %c0_i32 = arith.constant 0 : i32
    %c0_i32_0 = arith.constant 0 : i32
    return %arg0, %c0_i32 : i32, i32
  }
  func.func @transform_2(%arg0: i32) -> (i32, i32) {
    %c0_i32 = arith.constant 0 : i32
    %c0_i32_0 = arith.constant 0 : i32
    %c0_i32_1 = arith.constant 0 : i32
    return %c0_i32, %c0_i32_0 : i32, i32
  }
  func.func @transform_3(%arg0: i32) -> (i32, i32) {
    %c0_i32 = arith.constant 0 : i32
    %c0_i32_0 = arith.constant 0 : i32
    %c0_i32_1 = arith.constant 0 : i32
    return %c0_i32, %c0_i32_0 : i32, i32
  }
  func.func @transform_4(%arg0: i32) -> (i32, i32) {
    %c0_i32 = arith.constant 0 : i32
    %c0_i32_0 = arith.constant 0 : i32
    %c0_i32_1 = arith.constant 0 : i32
    return %c0_i32, %c0_i32_0 : i32, i32
  }
  func.func @transform_5(%arg0: i32) -> (i32, i32) {
    %c0_i32 = arith.constant 0 : i32
    %c0_i32_0 = arith.constant 0 : i32
    %c0_i32_1 = arith.constant 0 : i32
    return %c0_i32, %c0_i32_0 : i32, i32
  }
  func.func @transform_6(%arg0: i32) -> (i32, i32) {
    %c0_i32 = arith.constant 0 : i32
    %c0_i32_0 = arith.constant 0 : i32
    %c0_i32_1 = arith.constant 0 : i32
    return %c0_i32, %c0_i32_0 : i32, i32
  }
  func.func @transform_7(%arg0: i32) -> (i32, i32) {
    %c0_i32 = arith.constant 0 : i32
    %c0_i32_0 = arith.constant 0 : i32
    %c0_i32_1 = arith.constant 0 : i32
    return %c0_i32, %c0_i32_0 : i32, i32
  }
  func.func @transform_8(%arg0: i32) -> (i32, i32) {
    %c0_i32 = arith.constant 0 : i32
    %c0_i32_0 = arith.constant 0 : i32
    %c0_i32_1 = arith.constant 0 : i32
    return %c0_i32, %c0_i32_0 : i32, i32
  }
  func.func @transform_9(%arg0: i32) -> (i32, i32) {
    %c0_i32 = arith.constant 0 : i32
    %c0_i32_0 = arith.constant 0 : i32
    %c0_i32_1 = arith.constant 0 : i32
    return %c0_i32, %c0_i32_0 : i32, i32
  }
  func.func @transform_10(%arg0: i32) -> (i32, i32) {
    %c0_i32 = arith.constant 0 : i32
    %c0_i32_0 = arith.constant 0 : i32
    %c0_i32_1 = arith.constant 0 : i32
    return %c0_i32, %c0_i32_0 : i32, i32
  }
  func.func @transform_11(%arg0: i32) -> (i32, i32, i32) {
    %c0_i32 = arith.constant 0 : i32
    %c0_i32_0 = arith.constant 0 : i32
    %c0_i32_1 = arith.constant 0 : i32
    return %arg0, %c0_i32, %c0_i32_0 : i32, i32, i32
  }
}

</mosaic_0001>

<bundles_post_ra>
// kernel: tpu_custom_call.1
= control target key start
LH: loop header
LB: loop body
LE: loop exit
PB: predicated region body
PF: predicated region fallthrough
CT: control target
= control target key end

     0   :  { %s584_s0 = inlined_call_operand.vmem [shape: bf16[8,8], index: 0, kind: input, shape index: {}]   ;;  %s585_s1 = inlined_call_operand.vmem [shape: bf16[8,4], index: 1, kind: input, shape index: {}]   ;;  %s586_s2 = inlined_call_operand.vmem [shape: bf16[8,32], index: 2, kind: input, shape index: {}]   ;;  %s587_s3 = inlined_call_operand.vmem [shape: bf16[4,32], index: 3, kind: input, shape index: {}]   ;;  %s588_s4 = inlined_call_operand.vmem [shape: f32[1,32], index: 4, kind: input, shape index: {}]   ;;  %s589_s5 = inlined_call_operand.vmem [shape: bf16[32,64], index: 5, kind: input, shape index: {}]   ;;  %s590_s6 = inlined_call_operand.vmem [shape: f32[1,64], index: 6, kind: input, shape index: {}]   ;;  %s591_s7 = inlined_call_operand.vmem [shape: bf16[64,32], index: 7, kind: input, shape index: {}]   ;;  %s592_s8 = inlined_call_operand.vmem [shape: f32[1,32], index: 8, kind: input, shape index: {}]   ;;  %s593_s9 = inlined_call_operand.vmem [shape: bf16[1,32], index: 9, kind: input, shape index: {}]   ;;  %s594_s10 = inlined_call_operand.<no memory space> [shape: f32[1,1], index: 10, kind: input, shape index: {}]   ;;  %s595_s11 = inlined_call_operand.hbm [shape: f32[1,1,8], index: 11, kind: output, shape index: {}]  }
   0x1   :  { %v16_v0 = vstv %s594_s10 }
   0x2   :  { %17 = vst [vmem:[#allocation2] sm:$0x1] %v16_v0 }
   0x3   :  { %v45_v1 = vld [vmem:[%s587_s3] sm:$0x3]  ;;  %vm50_vm0 = vcmask 1041408   ;;  %v462_v3 = vmov 0.0   ;;  %vm98_vm1 = vcmask 1043456   ;;  %vm46_vm2 = vcmask 31744  }
   0x4   :  { %v44_v2 = vld [vmem:[%s586_s2] sm:$0xf]  ;;  %397 = vmatprep.subr.bf16.mxu0 %v462_v3  ;;  %403 = vmatprep.subr.bf16.mxu1 %v462_v3  ;;  %v52_v4 = vsel %vm50_vm0, %v45_v1, 0  ;;  %vm463_vm3 = vmmov 0   ;;  %vm94_vm4 = vcmask 64512  }
   0x5   :  { %v43_v5 = vld [vmem:[%s585_s1] sm:$0xf]  ;;  %398 = vmatpush3.bf16.msra.mxu0 %v52_v4  ;;  %v100_v6 = vsel %vm98_vm1, %v44_v2, 0  ;;  %399 = vmatprep.mubr.msk.bf16.mxu0 %vm463_vm3, %v462_v3 }
   0x6   :  { %v42_v7 = vld [vmem:[%s584_s0] sm:$0xf]  ;;  %404 = vmatpush3.bf16.msra.mxu1 %v100_v6  ;;  %405 = vmatprep.mubr.msk.bf16.mxu1 %vm463_vm3, %v462_v3 }
   0x7   :  { %409 = vmatprep.subr.bf16.mxu0 %v462_v3  ;;  %417 = vmatprep.subr.bf16.mxu1 %v462_v3 }
   0x8   :  { %400 = vmatmul.mubr.msk.bf16.vlgmr.msra.gmra.mrb[0].mxu0 %vm46_vm2, %v43_v5 }
   0x9   :  { %406 = vmatmul.mubr.msk.bf16.vlgmr.msra.gmra.mrb[0].mxu1 %vm94_vm4, %v42_v7  ;;  %413 = vmatprep.mubr.msk.bf16.mxu0 %vm463_vm3, %v462_v3 }
   0xa   :  { %18 = vsyncpa [#allocation4], 0  ;;  %425 = vmatprep.mubr.msk.bf16.mxu1 %vm463_vm3, %v462_v3  ;;  %v432_v8 = vld [vmem:[%s589_s5] sm:$0xff]   ;;  %v433_v9 = vld [vmem:[%s589_s5 + $0x8] sm:$0xff]   ;;  %vm175_vm5 = vcmask 261120   ;;  %vm260_vm6 = vcmask 523264   ;;  %v307_v35 = vlaneseq }
   0xb   :  { %410 = vmatpush3.bf16.msra.mxu0 %v432_v8  ;;  %v434_v10 = vld [vmem:[%s591_s7] sm:$0xff]   ;;  %v435_v11 = vld [vmem:[%s591_s7 + $0x8] sm:$0xff]   ;;  %v436_v25 = vld [vmem:[%s591_s7 + $0x10] sm:$0xff]   ;;  %vm355_vm7 = vcmask 57344  }
   0xc   :  { %411 = vmatprep.subr.bf16.mxu0 %v462_v3  ;;  %418 = vmatpush3.bf16.msra.mxu1 %v434_v10  ;;  %v373_v14 = vld [vmem:[%s588_s4] ss:$0 sm:$0xff]  ;;  %v437_v26 = vld [vmem:[%s591_s7 + $0x18] sm:$0xff]   ;;  %v308_v36 = vshrl.u32 %v307_v35, 7 }
   0xd   :  { %419 = vmatprep.subr.bf16.mxu1 %v462_v3  ;;  %v374_v27 = vld [vmem:[%s590_s6] ss:$0 sm:$0xff]  ;;  %s464_s6 = smov [#allocation3]  }
   0xe   :  { %v305_v37 = vld [vmem:[%s593_s9] sm:$0x1]  ;;  %v309_v39 = vsub.s32 0, %v308_v36  ;;  %s363_s9 = sshll.u32 %s464_s6, 4  ;;  %s364_s9 = int_to_ptr.vmem [resolvable:$true] %s363_s9 }
   0xf   :  { %412 = vmatpush3.bf16.msra.mxu0 %v433_v9  ;;  %v306_v38 = vunpack.c.l.bf16 %v305_v37  ;;  %v378_v40 = vld [vmem:[%s592_s8] ss:$0 sm:$0xff]  ;;  %s438_s8 = scalar_lea.vmem %s364_s9, 16  ;;  %s442_s20 = scalar_lea.vmem %s364_s9, 32 }
  0x10   :  { %420 = vmatpush3.bf16.msra.mxu1 %v435_v11  ;;  %v384_v50 = vld [vmem:[#allocation2] ss:$0 sm:$0xff]  ;;  %p439_p0 = scmp.ne.s32.totalorder %s364_s9, %s438_s8  ;;  %p443_p1 = scmp.lt.s32.totalorder %s364_s9, %s364_s9 }
  0x11   :  { %421 = vmatprep.subr.bf16.mxu1 %v462_v3  ;;  %v310_v44 = vrot.slane %v306_v38, %v309_v39  ;;  %p444_p2 = scmp.lt.s32.totalorder %s442_s20, %s438_s8 }
  0x13   :  { %p445_p3 = por %p444_p2, %p443_p1 }
  0x14   :  { %422 = vmatpush3.bf16.msra.mxu1 %v436_v25 }
  0x15   :  { %423 = vmatprep.subr.bf16.mxu1 %v462_v3  ;;  %p446_p4 = pnand %p445_p3, %p439_p0 }
  0x18   :  { %424 = vmatpush3.bf16.msra.mxu1 %v437_v26 }
  0xdb   :  { %v88_v12 = vpop.f32.mrb[0].mxu0 }
  0xdc   :  { %v136_v13 = vpop.f32.mrb[0].mxu1  ;;  %v401_v15 = vpop.f32.mrb[1].mxu0 }
  0xdd   :  { %v137_v16 = vadd.f32 %v136_v13, %v88_v12  ;;  %v407_v17 = vpop.f32.mrb[1].mxu1  ;;  %v91_v18 = vpop.f32.mrb[2].mxu0 }
  0xde   :  { %v139_v19 = vpop.f32.mrb[2].mxu1  ;;  %v402_v20 = vpop.f32.mrb[3].mxu0 }
  0xdf   :  { %v149_v21 = vadd.f32 %v373_v14, %v137_v16  ;;  %v408_v22 = vpop.f32.mrb[3].mxu1 }
  0xe1   :  { %v150_v23 = vmax.f32 %v149_v21, 0.0 }
  0xe3   :  { %v151_v24 = vpack.c.bf16 %v150_v23, %v150_v23 }
  0xe5   :  { %414 = vmatmul.mubr.msk.bf16.vlgmr.msra.gmra.mrb[4].mxu0 %vm175_vm5, %v151_v24 }
 0x1b8   :  { %v213_v28 = vpop.f32.mrb[4].mxu0 }
 0x1b9   :  { %v214_v29 = vadd.f32 %v374_v27, %v213_v28  ;;  %v415_v30 = vpop.f32.mrb[5].mxu0 }
 0x1ba   :  { %v216_v31 = vpop.f32.mrb[6].mxu0 }
 0x1bb   :  { %v219_v32 = vmax.f32 %v214_v29, 0.0  ;;  %v416_v33 = vpop.f32.mrb[7].mxu0 }
 0x1bd   :  { %v220_v34 = vpack.c.bf16 %v219_v32, %v219_v32 }
 0x1bf   :  { %426 = vmatmul.mubr.msk.bf16.vlgmr.msra.gmra.mrb[4].mxu1 %vm260_vm6, %v220_v34 }
 0x292   :  { %v298_v41 = vpop.f32.mrb[4].mxu1 }
 0x293   :  { %v299_v42 = vadd.f32 %v378_v40, %v298_v41  ;;  %v427_v43 = vpop.f32.mrb[5].mxu1 }
 0x294   :  { %v301_v45 = vpop.f32.mrb[6].mxu1 }
 0x295   :  { %v304_v46 = vmax.f32 %v299_v42, 0.0  ;;  %v428_v47 = vpop.f32.mrb[7].mxu1 }
 0x297   :  { %v311_v48 = vmul.f32 %v310_v44, %v304_v46 }
 0x299   :  { %v312_v49 = vsel %vm175_vm5, %v311_v48, 0.0 }
 0x29a   :  { %313 = vadd.xlane.f32.xlu0 %v312_v49 }
 0x327   :  { %v314_v51 = vpop.xlane.xlu0 %313 }
 0x328   :  { %v322_v52 = vadd.f32 %v384_v50, %v314_v51 }
 0x32a   :  { %323 = vxpose.xlu0.b32.start.end [1/1] (short) (narrow) %v322_v52, 8 }
 0x3aa   :  { %v339_v53 = vpop.trf.xlu0 }
 0x3ab   :  { %356 = vst.msk [vmem:[#allocation3] sm:$0x1] %vm355_vm7, %v339_v53 }
 0x3ac   :  { %449 = shalt.err (!%p446_p4)
}
 0x3ad   :  { %s450_s23 = scalar_lea.hbm %s595_s11, 16 }
 0x3ae   :  { %p451_p5 = scmp.ne.s32.totalorder %s595_s11, %s450_s23  ;;  %p454_p6 = scmp.lt.u32.totalorder %s450_s23, %s595_s11 }
 0x3b0   :  { %p456_p7 = pnand %p454_p6, %p451_p5 }
 0x3b2   :  { %459 = shalt.err (!%p456_p7)
}
 0x3b3   :  { %366 = dma.vmem_to_hbm [thread:$0]  %s364_s9, 16, %s595_s11, [#allocation4]  }
 0x3b4   :  { %460 = dma.done.wait [#allocation4], 16  }
 0x3b5   :  { %461 = vsyncadd [#allocation4], 4294967280 }
 0x3b6   :  { %370 = vsyncpa [#allocation4], 1 }

</bundles_post_ra>
